<compile_context>
chip_gen: v6e
topology: v6e:2x2x1
jax: 0.10.0
libtpu: 0.0.40
codegen_flags: <defaults>
</compile_context>

<pallas_src>
import math

import jax
import jax.numpy as jnp
from jax.experimental import pallas as pl
from jax.experimental.pallas import tpu as pltpu


def _round_up(x, m):
    return ((x + m - 1) // m) * m


# ----------------------------------------------------------------------------- kernel
def _bert_embed_kernel(x_ref, doy_ref, w_ref, b_ref, div_ref, out_ref):
    """Fused: obs = x @ W + b ; pos = sin/cos(doy * div_term) ; out[:, :E]=obs, out[:, E:]=pos.

    x_ref:   (tile_m, F)  f32  VMEM tile of the flattened (B*S, F) input
    doy_ref: (tile_m, 1)  i32  VMEM tile of day-of-year indices
    w_ref:   (F, E)       f32  Linear weight (in x out), grid-resident
    b_ref:   (1, E)       f32  Linear bias, grid-resident
    div_ref: (1, E)       f32  PE frequency per column (each div_term value duplicated
                               across its sin/cos column pair), grid-resident
    out_ref: (tile_m, 2E) f32  output tile
    """
    tile_m, F = x_ref.shape
    E = w_ref.shape[1]

    # (1) InputEmbedding: Linear(F -> E).  F is a handful of features, so unrolled
    #     VPU broadcast multiply-adds avoid the MXU push/pop latency entirely
    #     (review item: bypass MXU for K=4, N=32).  FLOPs are negligible either way.
    if F <= 16:
        obs = b_ref[...]                                   # (1, E), broadcasts below
        for k in range(F):                                 # static unroll
            obs = obs + x_ref[:, k:k + 1] * w_ref[k:k + 1, :]
    else:
        obs = jnp.dot(x_ref[...], w_ref[...],
                      preferred_element_type=jnp.float32) + b_ref[...]

    # (2) PositionalEncoding, vectorized recompute (replaces the serial per-row gather):
    #     angle[m, c] = doy[m] * div_term[c//2]; even columns -> sin, odd -> cos.
    #     Both transcendentals run on the otherwise-idle EUP; the select is one VPU op.
    doy_f = doy_ref[...].astype(jnp.float32)               # (tile_m, 1)
    angle = doy_f * div_ref[...]                           # (tile_m,1)*(1,E) -> (tile_m,E)
    col = jax.lax.broadcasted_iota(jnp.int32, (tile_m, E), 1)
    pos = jnp.where((col & 1) == 0, jnp.sin(angle), jnp.cos(angle))

    # (3) Write both halves straight into the output tile — no pos scratch, no
    #     jnp.concatenate lane-shift relayout (review item 2).
    out_ref[:, :E] = obs.astype(out_ref.dtype)
    out_ref[:, E:] = pos.astype(out_ref.dtype)
    # TODO(synk): nn.Dropout(p=0.2) is identity in eval mode; a training-mode mask would
    # need pltpu.prng_seed + pltpu.prng_random_bits.
    # TODO(synk): 2E=64 < 128 lanes, so output stores are half-masked vst.msk; the v5e
    # lane-packing suggestion ((Mp,64)->(Mp/2,128) fold) needs a lane-crossing reshape
    # in-kernel — left out to keep the lowering unconditionally supported.
    # TODO(synk): if profiling at large tile_m shows exposed DMA, add
    # pipeline_mode=pl.Buffered(3) on the x/out BlockSpecs (v6e review item).


# ----------------------------------------------------------------------------- wrapper
def bert_embedding_forward(input_sequence, doy_sequence, w, b, *, tile_m=4096):
    """input_sequence: (B, S, F) f32, doy_sequence: (B, S) int32.
    w: (F, E), b: (E,).  Returns (B, S, 2E) f32 = concat(x @ w + b, PE[doy])."""
    B, S, F = input_sequence.shape
    E = w.shape[1]
    M = B * S

    # Large default tile (review: step-overhead bound at 256 rows; sweep 2k-8k).
    # ~2 MiB per step with double buffering — far under v5e/v6e/v7x scoped VMEM.
    # Cap at ceil(M/2) so the "parallel" grid axis keeps >= 2 steps (v7x 2-TC sharding).
    tile_m = max(8, min(int(tile_m), _round_up(M, 8)))
    if M > 8:
        tile_m = min(tile_m, _round_up((M + 1) // 2, 8))
    tile_m = _round_up(tile_m, 8)
    Mp = _round_up(M, tile_m)

    x2d = input_sequence.reshape(M, F).astype(jnp.float32)
    doy2d = doy_sequence.reshape(M, 1).astype(jnp.int32)
    if Mp != M:
        x2d = jnp.pad(x2d, ((0, Mp - M), (0, 0)))
        doy2d = jnp.pad(doy2d, ((0, Mp - M), (0, 0)))   # pad rows discarded below

    w2d = w.astype(jnp.float32)
    b2d = b.reshape(1, E).astype(jnp.float32)

    # Per-frequency scale of the standard sin/cos PE, duplicated across each
    # (sin, cos) column pair -> (1, E).  Replaces the resident PE table.
    div_term = jnp.exp(jnp.arange(0, E, 2, dtype=jnp.float32)
                       * (-math.log(10000.0) / E))
    div_full = jnp.repeat(div_term, 2).reshape(1, E).astype(jnp.float32)

    grid = (Mp // tile_m,)
    cost = pl.CostEstimate(
        flops=2 * Mp * F * E + 4 * Mp * E,
        transcendentals=2 * Mp * E,
        bytes_accessed=4 * (Mp * F + Mp + F * E + 2 * E + Mp * 2 * E),
    )

    out2d = pl.pallas_call(
        _bert_embed_kernel,
        out_shape=jax.ShapeDtypeStruct((Mp, 2 * E), jnp.float32),
        grid=grid,
        in_specs=[
            pl.BlockSpec((tile_m, F), lambda i: (i, 0)),    # x tile, streams over M
            pl.BlockSpec((tile_m, 1), lambda i: (i, 0)),    # doy tile
            pl.BlockSpec((F, E), lambda i: (0, 0)),         # W resident
            pl.BlockSpec((1, E), lambda i: (0, 0)),         # b resident
            pl.BlockSpec((1, E), lambda i: (0, 0)),         # div_term resident
        ],
        out_specs=pl.BlockSpec((tile_m, 2 * E), lambda i: (i, 0)),
        compiler_params=pltpu.CompilerParams(
            dimension_semantics=("parallel",),              # M axis is embarrassingly parallel
            vmem_limit_bytes=32 * 1024 * 1024,
        ),
        cost_estimate=cost,
    )(x2d, doy2d, w2d, b2d, div_full)

    if Mp != M:
        out2d = out2d[:M]
    return out2d.reshape(B, S, 2 * E)


# ----------------------------------------------------------------------------- reference helpers
def make_positional_encoding(d_model, max_len):
    """Standard sin/cos PE table (max_len, d_model), matches PositionalEncoding."""
    position = jnp.arange(max_len, dtype=jnp.float32)[:, None]                      # (L, 1)
    div_term = jnp.exp(jnp.arange(0, d_model, 2, dtype=jnp.float32)
                       * (-math.log(10000.0) / d_model))                            # (d/2,)
    pe = jnp.zeros((max_len, d_model), dtype=jnp.float32)
    pe = pe.at[:, 0::2].set(jnp.sin(position * div_term))
    pe = pe.at[:, 1::2].set(jnp.cos(position * div_term))
    return pe


# ----------------------------------------------------------------------------- main
if __name__ == "__main__":
    B, S = 2, 8            # batch, sequence length
    F = 4                  # num_features
    E = 32                 # embedding_dim
    MAX_LEN = 1825

    key = jax.random.PRNGKey(0)
    k_x, k_doy, k_w, k_b = jax.random.split(key, 4)

    input_sequence = jax.random.normal(k_x, (B, S, F), dtype=jnp.float32)
    doy_sequence = jax.random.randint(k_doy, (B, S), 0, 366, dtype=jnp.int32)

    # Deterministic synthetic Linear parameters (PyTorch weight is (E,F); we store (F,E)).
    w = jax.random.normal(k_w, (F, E), dtype=jnp.float32) * 0.1
    b = jax.random.normal(k_b, (E,), dtype=jnp.float32) * 0.1

    # Small tile so the demo exercises a multi-step (grid=(2,)) pipelined grid.
    out = bert_embedding_forward(input_sequence, doy_sequence, w, b, tile_m=8)
    out = jax.block_until_ready(out)

    # Pure-JAX reference of the PyTorch forward (eval-mode dropout = identity).
    pe_table = make_positional_encoding(E, MAX_LEN)
    obs_ref = input_sequence @ w + b                    # (B, S, E)
    pos_ref = pe_table[doy_sequence]                    # (B, S, E)
    ref = jnp.concatenate([obs_ref, pos_ref], axis=-1)  # (B, S, 2E)

    assert out.shape == (B, S, 2 * E), out.shape
    err = float(jnp.max(jnp.abs(out - ref)))
    # atol 1e-4: the kernel recomputes sin/cos in-kernel; range reduction at doy<=365
    # can differ from XLA's table-build sin/cos by O(1e-5) absolute.
    assert jnp.allclose(out, ref, atol=1e-4, rtol=1e-4), err
    print("KERNEL_OK")
</pallas_src>

<mosaic_0001>
module attributes {stable_mosaic.version = 11 : i64} {
  func.func @_bert_embed_kernel(%arg0: i32, %arg1: memref<8x4xf32, #tpu.memory_space<vmem>>, %arg2: memref<8x1xi32, #tpu.memory_space<vmem>>, %arg3: memref<4x32xf32, #tpu.memory_space<vmem>>, %arg4: memref<1x32xf32, #tpu.memory_space<vmem>>, %arg5: memref<1x32xf32, #tpu.memory_space<vmem>>, %arg6: memref<8x64xf32, #tpu.memory_space<vmem>>) attributes {dimension_semantics = [#tpu.dimension_semantics<parallel>], iteration_bounds = array<i64: 2>, scalar_prefetch = 0 : i64, scratch_operands = 0 : i64, tpu.core_type = #tpu.core_type<tc>, window_params = [{transform_indices = @transform_0, window_bounds = array<i64: 8, 4>}, {transform_indices = @transform_1, window_bounds = array<i64: 8, 1>}, {pipeline_mode = #tpu.pipeline_mode<synchronous>, transform_indices = @transform_2, window_bounds = array<i64: 4, 32>}, {pipeline_mode = #tpu.pipeline_mode<synchronous>, transform_indices = @transform_3, window_bounds = array<i64: 1, 32>}, {pipeline_mode = #tpu.pipeline_mode<synchronous>, transform_indices = @transform_4, window_bounds = array<i64: 1, 32>}, {transform_indices = @transform_5, window_bounds = array<i64: 8, 64>}]} {
    %c0 = arith.constant 0 : index
    %c0_0 = arith.constant 0 : index
    %0 = vector.load %arg4[%c0, %c0_0] : memref<1x32xf32, #tpu.memory_space<vmem>>, vector<1x32xf32>
    %c0_1 = arith.constant 0 : index
    %c0_2 = arith.constant 0 : index
    %1 = vector.load %arg1[%c0_1, %c0_2] : memref<8x4xf32, #tpu.memory_space<vmem>>, vector<8x1xf32>
    %c0_3 = arith.constant 0 : index
    %c0_4 = arith.constant 0 : index
    %2 = vector.load %arg3[%c0_3, %c0_4] : memref<4x32xf32, #tpu.memory_space<vmem>>, vector<1x32xf32>
    %3 = vector.broadcast %1 : vector<8x1xf32> to vector<8x32xf32>
    %4 = vector.broadcast %2 : vector<1x32xf32> to vector<8x32xf32>
    %5 = arith.mulf %3, %4 : vector<8x32xf32>
    %6 = vector.broadcast %0 : vector<1x32xf32> to vector<8x32xf32>
    %7 = arith.addf %6, %5 : vector<8x32xf32>
    %c0_5 = arith.constant 0 : index
    %c1 = arith.constant 1 : index
    %8 = vector.load %arg1[%c0_5, %c1] : memref<8x4xf32, #tpu.memory_space<vmem>>, vector<8x1xf32>
    %c1_6 = arith.constant 1 : index
    %c0_7 = arith.constant 0 : index
    %9 = vector.load %arg3[%c1_6, %c0_7] : memref<4x32xf32, #tpu.memory_space<vmem>>, vector<1x32xf32>
    %10 = vector.broadcast %8 : vector<8x1xf32> to vector<8x32xf32>
    %11 = vector.broadcast %9 : vector<1x32xf32> to vector<8x32xf32>
    %12 = arith.mulf %10, %11 : vector<8x32xf32>
    %13 = arith.addf %7, %12 : vector<8x32xf32>
    %c0_8 = arith.constant 0 : index
    %c2 = arith.constant 2 : index
    %14 = vector.load %arg1[%c0_8, %c2] : memref<8x4xf32, #tpu.memory_space<vmem>>, vector<8x1xf32>
    %c2_9 = arith.constant 2 : index
    %c0_10 = arith.constant 0 : index
    %15 = vector.load %arg3[%c2_9, %c0_10] : memref<4x32xf32, #tpu.memory_space<vmem>>, vector<1x32xf32>
    %16 = vector.broadcast %14 : vector<8x1xf32> to vector<8x32xf32>
    %17 = vector.broadcast %15 : vector<1x32xf32> to vector<8x32xf32>
    %18 = arith.mulf %16, %17 : vector<8x32xf32>
    %19 = arith.addf %13, %18 : vector<8x32xf32>
    %c0_11 = arith.constant 0 : index
    %c3 = arith.constant 3 : index
    %20 = vector.load %arg1[%c0_11, %c3] : memref<8x4xf32, #tpu.memory_space<vmem>>, vector<8x1xf32>
    %c3_12 = arith.constant 3 : index
    %c0_13 = arith.constant 0 : index
    %21 = vector.load %arg3[%c3_12, %c0_13] : memref<4x32xf32, #tpu.memory_space<vmem>>, vector<1x32xf32>
    %22 = vector.broadcast %20 : vector<8x1xf32> to vector<8x32xf32>
    %23 = vector.broadcast %21 : vector<1x32xf32> to vector<8x32xf32>
    %24 = arith.mulf %22, %23 : vector<8x32xf32>
    %25 = arith.addf %19, %24 : vector<8x32xf32>
    %c0_14 = arith.constant 0 : index
    %c0_15 = arith.constant 0 : index
    %26 = vector.load %arg2[%c0_14, %c0_15] : memref<8x1xi32, #tpu.memory_space<vmem>>, vector<8x1xi32>
    %27 = arith.sitofp %26 : vector<8x1xi32> to vector<8x1xf32>
    %c0_16 = arith.constant 0 : index
    %c0_17 = arith.constant 0 : index
    %28 = vector.load %arg5[%c0_16, %c0_17] : memref<1x32xf32, #tpu.memory_space<vmem>>, vector<1x32xf32>
    %29 = vector.broadcast %27 : vector<8x1xf32> to vector<8x32xf32>
    %30 = vector.broadcast %28 : vector<1x32xf32> to vector<8x32xf32>
    %31 = arith.mulf %29, %30 : vector<8x32xf32>
    %32 = tpu.iota {dimensions = array<i32: 1>} : vector<8x32xi32>
    %c1_i32 = arith.constant 1 : i32
    %33 = vector.broadcast %c1_i32 : i32 to vector<8x32xi32>
    %34 = arith.andi %32, %33 : vector<8x32xi32>
    %c0_i32 = arith.constant 0 : i32
    %35 = vector.broadcast %c0_i32 : i32 to vector<8x32xi32>
    %36 = arith.cmpi eq, %34, %35 : vector<8x32xi32>
    %37 = math.sin %31 : vector<8x32xf32>
    %38 = math.cos %31 : vector<8x32xf32>
    %39 = arith.select %36, %37, %38 : vector<8x32xi1>, vector<8x32xf32>
    %c0_18 = arith.constant 0 : index
    %c0_19 = arith.constant 0 : index
    %40 = vector.load %arg6[%c0_18, %c0_19] : memref<8x64xf32, #tpu.memory_space<vmem>>, vector<8x32xf32>
    tpu.vector_store %arg6[%c0_18, %c0_19], %25 {strides = array<i32>} : memref<8x64xf32, #tpu.memory_space<vmem>>, vector<8x32xf32>,
    %c0_20 = arith.constant 0 : index
    %c32 = arith.constant 32 : index
    %41 = vector.load %arg6[%c0_20, %c32] : memref<8x64xf32, #tpu.memory_space<vmem>>, vector<8x32xf32>
    tpu.vector_store %arg6[%c0_20, %c32], %39 {strides = array<i32>} : memref<8x64xf32, #tpu.memory_space<vmem>>, vector<8x32xf32>,
    return
  }
  func.func @transform_0(%arg0: i32) -> (i32, i32) {
    %c0_i32 = arith.constant 0 : i32
    %c0_i32_0 = arith.constant 0 : i32
    return %arg0, %c0_i32 : i32, i32
  }
  func.func @transform_1(%arg0: i32) -> (i32, i32) {
    %c0_i32 = arith.constant 0 : i32
    %c0_i32_0 = arith.constant 0 : i32
    return %arg0, %c0_i32 : i32, i32
  }
  func.func @transform_2(%arg0: i32) -> (i32, i32) {
    %c0_i32 = arith.constant 0 : i32
    %c0_i32_0 = arith.constant 0 : i32
    %c0_i32_1 = arith.constant 0 : i32
    return %c0_i32, %c0_i32_0 : i32, i32
  }
  func.func @transform_3(%arg0: i32) -> (i32, i32) {
    %c0_i32 = arith.constant 0 : i32
    %c0_i32_0 = arith.constant 0 : i32
    %c0_i32_1 = arith.constant 0 : i32
    return %c0_i32, %c0_i32_0 : i32, i32
  }
  func.func @transform_4(%arg0: i32) -> (i32, i32) {
    %c0_i32 = arith.constant 0 : i32
    %c0_i32_0 = arith.constant 0 : i32
    %c0_i32_1 = arith.constant 0 : i32
    return %c0_i32, %c0_i32_0 : i32, i32
  }
  func.func @transform_5(%arg0: i32) -> (i32, i32) {
    %c0_i32 = arith.constant 0 : i32
    %c0_i32_0 = arith.constant 0 : i32
    return %arg0, %c0_i32 : i32, i32
  }
}

</mosaic_0001>

<bundles_post_ra>
// kernel: tpu_custom_call.1
= control target key start
LH: loop header
LB: loop body
LE: loop exit
PB: predicated region body
PF: predicated region fallthrough
CT: control target
= control target key end

     0   :  { %10 = vsyncpa [#allocation3], 0  ;;  %s952_s0 = inlined_call_operand.vmem [shape: f32[16,4], index: 0, kind: input, shape index: {}]   ;;  %s953_s1 = inlined_call_operand.vmem [shape: s32[16,1], index: 1, kind: input, shape index: {}]   ;;  %s954_s2 = inlined_call_operand.vmem [shape: f32[4,32], index: 2, kind: input, shape index: {}]   ;;  %s955_s3 = inlined_call_operand.vmem [shape: f32[1,32], index: 3, kind: input, shape index: {}]   ;;  %s956_s4 = inlined_call_operand.vmem [shape: f32[1,32], index: 4, kind: input, shape index: {}]   ;;  %s957_s5 = inlined_call_operand.hbm [shape: f32[16,64], index: 5, kind: output, shape index: {}]  }
   0x1   :  { %12 = vsyncpa [#allocation3 + $0x1], 0  ;;  %s802_s18 = smov 0   ;;  %s804_s19 = smov 0  }
   0x2   :  { %s806_s20 = smov 0   ;;  %s808_s21 = smov 0  }
   0x3 LB: > { %s823_s22 = sadd.s32 4294967295, %s758_s21   ;;  %s610_s23 = sadd.s32 4294967294, %s758_s21   ;;  %s758_s21 = sphi %s808_s21, %s965_s21   ;;  %s754_s20 = sphi %s806_s20, %s964_s20   ;;  %s750_s19 = sphi %s804_s19, %s963_s19   ;;  %s746_s18 = sphi %s802_s18, %s962_s18  }
   0x4   : > { %s827_s24 = sadd.s32 1, %s758_s21   ;;  %s140_s25 = sadd.s32 1, %s754_s20 }
   0x5   : > { %s137_s26 = ssub.s32 %s758_s21, %s827_s24  ;;  %p150_p0 = scmp.ne.s32.totalorder %s754_s20, %s750_s19 }
   0x6   : > { %p138_p1 = scmp.eq.s32.totalorder %s137_s26, 0  ;;  %p151_p2 = scmp.eq.s32.totalorder %s823_s22, 1 }
   0x7   : > { %p156_p3 = scmp.ne.s32.totalorder %s750_s19, %s746_s18  ;;  %p157_p4 = scmp.eq.s32.totalorder %s610_s23, 1 }
   0x8   : > { %s838_s27 = scalar_select %p138_p1, %s754_s20, %s140_s25  }
   0x9   : > { %p840_p5 = por %p151_p2, %p150_p0  ;;  %p844_p6 = por %p157_p4, %p156_p3 }
   0xa   : > { %p613_p7 = scmp.ge.s32.totalorder %s758_s21, 1  ;;  %p198_p8 = scmp.lt.s32.totalorder %s758_s21, 3 }
   0xc   : > { %p199_p9 = pnand %p613_p7, %p198_p8 }
   0xd   : > { %p229_p10 = scmp.lt.s32.totalorder (!%p199_p9), %s823_s22, 1  ;;  %s226_s7 = sand.u32 (!%p199_p9), 1, %s750_s19  }
   0xe   : > { %202 = sbr.rel (%p199_p9) target bundleno = 363 (0x16b), region = 40  ;;  %s614_s10 = sshll.u32 (!%p199_p9), %s226_s7, 3 }
   0xf   : > { %s885_s11 = scalar_lea.vmem (!%p199_p9), [#allocation2], %s614_s10  ;;  %s632_s13 = sshll.u32 (!%p199_p9), %s823_s22, 7 }
  0x10   : > { %s539_s14 = sshll.u32 (!%p199_p9), %s885_s11, 4  ;;  %s914_s17 = scalar_lea.hbm (!%p199_p9), %s957_s5, %s632_s13  ;;  %s540_s14 = int_to_ptr.vmem [resolvable:$true] %s539_s14 }
  0x11   : > { %s526_s23 = scalar_lea.sflag (!%p199_p9), [#allocation3], %s226_s7  ;;  %s698_s25 = scalar_lea.vmem (!%p199_p9), %s540_s14, 128 }
  0x12   : > { %p699_p11 = scmp.ne.s32.totalorder (!%p199_p9), %s540_s14, %s698_s25  ;;  %s771_s26 = smov (!%p199_p9), [#allocation2]  }
  0x13   : > { %v760_v0 = vmov 0   ;;  %v761_v1 = vmov 1   ;;  %s230_s30 = scalar_select %p229_p10, %s823_s22, 1  ;;  %v762_v5 = vmov 2   ;;  %v763_v6 = vmov 3  }
  0x14   : > { %689 = vset.pattern.permute.xlu0 %v760_v0  ;;  %690 = vset.pattern.permute.xlu1 %v761_v1  ;;  %v622_v7 = vld [vmem:[%s956_s4] ss:$0 sm:$0xff]  ;;  %v619_v11 = vld [vmem:[%s954_s2 + $0x1] ss:$0 sm:$0xff]  ;;  %v620_v16 = vld [vmem:[%s954_s2 + $0x2] ss:$0 sm:$0xff]  ;;  %p700_p12 = pnand %p699_p11, %p840_p5 }
  0x15   : > { %s615_s6 = sshll.u32 %s230_s30, 3  ;;  %v617_v12 = vld [vmem:[%s954_s2] ss:$0 sm:$0xff]  ;;  %v621_v24 = vld [vmem:[%s954_s2 + $0x3] ss:$0 sm:$0xff]  ;;  %vm517_vm1 = vcmask 261120  }
  0x16   : > { %s236_s9 = scalar_lea.vmem %s953_s1, %s615_s6  ;;  %s232_s12 = scalar_lea.vmem %s952_s0, %s615_s6  ;;  %v618_v14 = vld [vmem:[%s955_s3] ss:$0 sm:$0xff]  ;;  %v764_v37 = vmov 683565275   ;;  %v765_v39 = vmov 2475754826  }
  0x17   : > { %v290_v2 = vld [vmem:[%s236_s9] sm:$0xff]  ;;  %v766_v42 = vmov 2131351028   ;;  %v767_v45 = vmov 2102212464   ;;  %p701_p13 = pneg %p700_p12  ;;  %s702_s30 = sshll.u32 %s771_s26, 4  ;;  %s703_s30 = int_to_ptr.vmem [resolvable:$false] %s702_s30 }
  0x18   : > { %v238_v3 = vld [vmem:[%s232_s12] sm:$0xff]  ;;  %v291_v4 = vcvt.s32.f32 %v290_v2  ;;  %v768_v48 = vmov 920167782   ;;  %v769_v51 = vmov 1326507024   ;;  %s770_s12 = smov 32   ;;  %p705_p0 = scmp.lt.s32.totalorder %s540_s14, %s703_s30 }
  0x19   : > { %259 = vperm.xlu1 %690, %v238_v3   ;;  %s704_s22 = scalar_lea.vmem %s703_s30, 256 }
  0x1a   : > { %295 = vperm.xlu0 %689, %v291_v4   ;;  %p706_p1 = scmp.lt.s32.totalorder %s704_s22, %s698_s25 }
  0x1c   : > { %p707_p2 = por %p706_p1, %p705_p0 }
  0x1d   : > { %691 = vset.pattern.permute.xlu1 %v762_v5 }
  0x1e   : > { %270 = vperm.xlu1 %691, %v238_v3   ;;  %242 = vperm.xlu0 %689, %v238_v3   ;;  %p708_p3 = pnand %p707_p2, %p701_p13 }
  0x22   : > { %692 = vset.pattern.permute.xlu0 %v763_v6 }
  0x23   : > { %281 = vperm.xlu0 %692, %v238_v3  }
  0x27   : > { %693 = vset.pattern.permute.xlu0 %v760_v0 }
  0x94   : > { %v260_v8 = vpop.permute.xlu1 %259 }
  0x95   : > { %v296_v9 = vpop.permute.xlu0 %295  ;;  %v266_v19 = vmul.f32 %v619_v11, %v260_v8 }
  0x96   : > { %v861_v10 = vmul.f32 %v622_v7, %v296_v9 }
  0x98   : > { %v312_v13 = vand.u32 2139095040, %v861_v10  ;;  %v309_v29 = vand.u32 2147483647, %v861_v10  ;;  %vm311_vm8 = vcmp.lt.s32.totalorder %v861_v10, 0 }
  0x99   : > { %v243_v15 = vpop.permute.xlu0 %242  ;;  %v271_v17 = vpop.permute.xlu1 %270 }
  0x9a   : > { %v313_v18 = vshrl.u32 %v312_v13, 23  ;;  %v249_v20 = vmul.f32 %v617_v12, %v243_v15  ;;  %v277_v23 = vmul.f32 %v620_v16, %v271_v17  ;;  %v316_v34 = vand.u32 8388607, %v309_v29 }
  0x9b   : > { %vm310_vm9 = vcmp.le.f32.partialorder %v309_v29, 0.7853982 }
  0x9c   : > { %v623_v21 = vadd.s32 4294967169, %v313_v18  ;;  %v256_v22 = vadd.f32 %v618_v14, %v249_v20  ;;  %v317_v53 = vor.u32 8388608, %v316_v34 }
  0x9e   : > { %v319_v25 = vadd.s32 1, %v623_v21  ;;  %v267_v26 = vadd.f32 %v266_v19, %v256_v22  ;;  %v282_v27 = vpop.permute.xlu0 %281  ;;  %v357_v3 = vshll.u32 %v317_v53, 8 }
  0x9f   : > { %v288_v28 = vmul.f32 %v621_v24, %v282_v27 }
  0xa0   : > { %vm320_vm0 = vcmp.gt.s32.totalorder %v319_v25, 0  ;;  %v278_v30 = vadd.f32 %v277_v23, %v267_v26 }
  0xa1   : > { %v321_v31 = vsel %vm320_vm0, %v319_v25, 0 }
  0xa2   : > { %v323_v32 = vand.u32 31, %v321_v31  ;;  %v289_v33 = vadd.f32 %v288_v28, %v278_v30  ;;  %v322_v36 = vshrl.u32 %v321_v31, 5 }
  0xa4   : > { %v324_v35 = vsub.s32 32, %v323_v32  ;;  %518 = vst.msk [vmem:[%s885_s11] sm:$0xff] %vm517_vm1, %v289_v33  ;;  %v326_v38 = vshll.u32 %v764_v37, %v323_v32  ;;  %v329_v40 = vshll.u32 %v765_v39, %v323_v32  ;;  %v332_v44 = vshll.u32 %v766_v42, %v323_v32 }
  0xa5   : > { %v335_v47 = vshll.u32 %v767_v45, %v323_v32  ;;  %v338_v50 = vshll.u32 %v768_v48, %v323_v32  ;;  %vm341_vm2 = vcmp.lt.s32.totalorder %v322_v36, 1  ;;  %vm344_vm3 = vcmp.lt.s32.totalorder %v322_v36, 4 }
  0xa6   : > { %v327_v41 = vshrl.u32 %v765_v39, %v324_v35  ;;  %v330_v43 = vshrl.u32 %v766_v42, %v324_v35  ;;  %v333_v46 = vshrl.u32 %v767_v45, %v324_v35  ;;  %v336_v49 = vshrl.u32 %v768_v48, %v324_v35 }
  0xa7   : > { %v339_v52 = vshrl.u32 %v769_v51, %v324_v35  ;;  %v325_v62 = vshrl.u32 %v764_v37, %v324_v35  ;;  %vm343_vm4 = vcmp.lt.s32.totalorder %v322_v36, 3  ;;  %vm342_vm5 = vcmp.lt.s32.totalorder %v322_v36, 2 }
  0xa8   : > { %v328_v54 = vor.u32 %v327_v41, %v326_v38  ;;  %v331_v55 = vor.u32 %v330_v43, %v329_v40  ;;  %v334_v56 = vor.u32 %v333_v46, %v332_v44  ;;  %v337_v57 = vor.u32 %v336_v49, %v335_v47 }
  0xa9   : > { %v340_v58 = vor.u32 %v339_v52, %v338_v50  ;;  %v305_v45 = vlaneseq  ;;  %vm401_vm1 = vweird.f32 %v861_v10 }
  0xaa   : > { %v346_v59 = vsel %vm344_vm3, %v334_v56, 2102212464  ;;  %v349_v60 = vsel %vm341_vm2, %v328_v54, %v331_v55  ;;  %v353_v61 = vsel %vm341_vm2, %v331_v55, %v334_v56  ;;  %v350_v63 = vsel %vm344_vm3, %v337_v57, 920167782 }
  0xab   : > { %v354_v0 = vsel %vm344_vm3, %v340_v58, 1326507024  ;;  %v351_v1 = vsel %vm343_vm4, %v334_v56, %v350_v63  ;;  %v345_v4 = vsel %vm341_vm2, %v325_v62, %v328_v54  ;;  %v347_v5 = vsel %vm343_vm4, %v331_v55, %v346_v59 }
  0xac   : > { %v355_v2 = vsel %vm343_vm4, %v337_v57, %v354_v0  ;;  %v352_v6 = vsel %vm342_vm5, %v349_v60, %v351_v1  ;;  %v348_v13 = vsel %vm342_vm5, %v345_v4, %v347_v5  ;;  %v306_v47 = vand.u32 127, %v305_v45 }
  0xad   : > { %v356_v7 = vsel %vm342_vm5, %v353_v61, %v355_v2  ;;  %v891_v11 = vmul.u32.u64.low %v357_v3, %v352_v6  ;;  %v892_v12 = vmul.u32.u64.high %v357_v3, %v352_v6, %v891_v11  ;;  %v364_v15 = vmul.u32 %v357_v3, %v348_v13 }
  0xae   : > { %v888_v8 = vmul.u32.u64.low %v357_v3, %v356_v7  ;;  %v889_v9 = vmul.u32.u64.high %v357_v3, %v356_v7, %v888_v8  ;;  %v307_v49 = vand.u32 1, %v306_v47  ;;  %vm523_vm2 = vcmask 523520  }
  0xaf   : > { %v367_v14 = vadd.s32 1, %v892_v12 }
  0xb0   : > { %vm366_vm6 = vc.u32 %v889_v9, %v891_v11  ;;  %v365_v27 = vadd.s32 %v891_v11, %v889_v9  ;;  %vm902_vm10 = vcmp.eq.s32.totalorder %v307_v49, 0 }
  0xb1   : > { %v368_v16 = vsel %vm366_vm6, %v367_v14, %v892_v12 }
  0xb2   : > { %v369_v17 = vadd.s32 %v368_v16, %v364_v15 }
  0xb4   : > { %v370_v18 = vadd.s32 536870912, %v369_v17 }
  0xb6   : > { %v371_v19 = vshrl.u32 %v370_v18, 30 }
  0xb8   : > { %v372_v20 = vshll.u32 %v371_v19, 30  ;;  %v395_v41 = vsub.s32 4, %v371_v19 }
  0xba   : > { %v373_v21 = vsub.s32 %v369_v17, %v372_v20  ;;  %v396_v44 = vsel %vm311_vm8, %v395_v41, %v371_v19 }
  0xbb   : > { %v398_v46 = vsel %vm310_vm9, 0, %v396_v44 }
  0xbc   : > { %v375_v22 = vsub.s32 0, %v373_v21  ;;  %v402_v48 = vadd.s32 3, %v398_v46  ;;  %v506_v51 = vand.u32 3, %v398_v46 }
  0xbe   : > { %v624_v23 = vmin.u32 %v375_v22, %v373_v21  ;;  %v403_v50 = vand.u32 3, %v402_v48  ;;  %vm511_vm12 = vcmp.eq.s32.totalorder %v506_v51, 2  ;;  %vm508_vm14 = vcmp.eq.s32.totalorder %v506_v51, 0 }
  0xbf   : > { %vm507_vm0 = vcmp.lt.s32.totalorder %v506_v51, 2 }
  0xc0   : > { %v377_v24 = vclz %v624_v23  ;;  %vm408_vm11 = vcmp.eq.s32.totalorder %v403_v50, 2  ;;  %vm405_vm13 = vcmp.eq.s32.totalorder %v403_v50, 0  ;;  %vm404_vm15 = vcmp.lt.s32.totalorder %v403_v50, 2 }
  0xc2   : > { %v625_v25 = vadd.s32 4294967294, %v377_v24 }
  0xc4   : > { %vm626_vm7 = vcmp.lt.s32.totalorder %v625_v25, 0 }
  0xc5   : > { %v380_v26 = vsel %vm626_vm7, 0, %v625_v25 }
  0xc6   : > { %v381_v28 = vsub.s32 32, %v380_v26  ;;  %v385_v30 = vsub.s32 4294967266, %v380_v26  ;;  %v382_v31 = vshll.u32 %v373_v21, %v380_v26 }
  0xc8   : > { %v383_v32 = vshrl.u32 %v365_v27, %v381_v28  ;;  %v386_v33 = vadd.s32 127, %v385_v30 }
  0xca   : > { %v384_v34 = vor.u32 %v383_v32, %v382_v31  ;;  %v387_v35 = vshll.u32 %v386_v33, 23 }
  0xcc   : > { %v388_v36 = vor.u32 4788187, %v387_v35  ;;  %v391_v38 = vcvt.s32.f32 %v384_v34 }
  0xce   : > { %v389_v37 = vand.u32 2147483647, %v388_v36 }
  0xd0   : > { %v392_v39 = vmul.f32 %v391_v38, %v389_v37 }
  0xd2   : > { %v393_v40 = vxor.u32 2147483648, %v392_v39 }
  0xd4   : > { %v394_v42 = vsel %vm311_vm8, %v393_v40, %v392_v39 }
  0xd5   : > { %v397_v43 = vsel %vm310_vm9, %v861_v10, %v394_v42 }
  0xd6   : > { %694 = vcosq.f32 %v397_v43 }
  0xd7   : > { %696 = vsinq.f32 %v397_v43 }
  0xe3   : > { %v695_v52 = vpop.eup %694 }
  0xe4   : > { %v697_v53 = vpop.eup %696  ;;  %v409_v54 = vxor.u32 2147483648, %v695_v52 }
  0xe5   : > { %v406_v29 = vxor.u32 2147483648, %v697_v53 }
  0xe6   : > { %v410_v56 = vsel %vm408_vm11, %v409_v54, %v697_v53  ;;  %v513_v57 = vsel %vm511_vm12, %v409_v54, %v697_v53 }
  0xe7   : > { %v407_v58 = vsel %vm405_vm13, %v695_v52, %v406_v29  ;;  %v510_v59 = vsel %vm508_vm14, %v695_v52, %v406_v29 }
  0xe8   : > { %v411_v60 = vsel %vm404_vm15, %v407_v58, %v410_v56  ;;  %v514_v61 = vsel %vm507_vm0, %v510_v59, %v513_v57 }
  0xe9   : > { %v412_v62 = vsel %vm401_vm1, nan, %v411_v60  ;;  %v515_v63 = vsel %vm401_vm1, nan, %v514_v61 }
  0xea   : > { %v516_v0 = vsel %vm902_vm10, %v412_v62, %v515_v63 }
  0xeb   : > { %520 = vrot.lane.b32.xlu1 %v516_v0, %s770_s12 }
 0x15d   : > { %v521_v10 = vpop.permute.xlu1 %520 }
 0x15e   : > { %524 = vst.msk [vmem:[%s885_s11] sm:$0xff] %vm523_vm2, %v521_v10 }
 0x15f   : > { %711 = shalt.err (!%p708_p3)
}
 0x160   : > { %s712_s6 = scalar_lea.hbm %s914_s17, 128  ;;  %s716_s9 = scalar_lea.hbm %s957_s5, 256 }
 0x161   : > { %p713_p4 = scmp.ne.s32.totalorder %s914_s17, %s712_s6  ;;  %p717_p9 = scmp.lt.s32.totalorder %s914_s17, %s957_s5 }
 0x162   : > { %p718_p10 = scmp.lt.s32.totalorder %s716_s9, %s712_s6 }
 0x163   : > { %p714_p7 = pnand %p713_p4, %p840_p5 }
 0x164   : > { %p719_p11 = por %p718_p10, %p717_p9 }
 0x165   : > { %p715_p8 = pneg %p714_p7 }
 0x167   : > { %p720_p12 = pnand %p719_p11, %p715_p8 }
 0x169   : > { %723 = shalt.err (!%p720_p12)
}
 0x16a   : > { %639 = dma.vmem_to_hbm [thread:$0]  (%p840_p5), %s540_s14, 128, %s914_s17, %s526_s23  }
 0x16b PF: > { %p645_p13 = scmp.ge.s32.totalorder %s758_s21, 2  ;;  %s551_s12 = sand.u32 1, %s746_s18  }
 0x16c   : > { %s552_s13 = scalar_lea.sflag [#allocation3], %s551_s12 }
 0x16d   : > { %p642_p0 = pnand %p645_p13, %p844_p6 }
 0x16f   : > { %p643_p1 = pneg %p642_p0 }
 0x171   : > { %741 = dma.done.wait (%p643_p1), %s552_s13, 128  }
 0x172   : > { %743 = vsyncadd (%p643_p1), %s552_s13, 4294967168  ;;  %p15_p2 = scmp.ge.s32.totalorder %s827_s24, 4   ;;  %s962_s18 = smov %s750_s19 }
 0x173   : > { %s963_s19 = smov %s754_s20  ;;  %s964_s20 = smov %s838_s27 }
 0x174   : > { %s965_s21 = smov %s827_s24  ;;  %17 = sbr.rel (!%p15_p2) target bundleno = 3 (0x3), region = 78 }
 0x179   :  { %557 = vsyncpa [#allocation3], 1 }
 0x17a   :  { %559 = vsyncpa [#allocation3 + $0x1], 1 }

</bundles_post_ra>
